<compile_context>
chip_gen: v7x
topology: tpu7x:2x2x1
jax: 0.10.0
libtpu: 0.0.40
codegen_flags: <defaults>
</compile_context>

<pallas_src>
import math

import jax
import jax.numpy as jnp
from jax import lax
from jax.experimental import pallas as pl
from jax.experimental.pallas import tpu as pltpu

LN_EPS = 1e-5                     # nn.LayerNorm default eps
_INV_SQRT2 = 1.0 / math.sqrt(2.0)


# --------------------------------------------------------------------------
# Kernel
# --------------------------------------------------------------------------
def _roberta_adapter_kernel(hid_ref, inp_ref,
                            wd_ref, bd_ref, gamma_ref, beta_ref,
                            w0_ref, b0_ref, w1_ref, b1_ref,
                            out_ref):
    """One (TM, *) row tile of:
       dense(I->H) -> +input -> LayerNorm -> lin0 -> GELU -> lin1 -> +x."""
    inp = inp_ref[...].astype(jnp.float32)                       # (TM, H)

    # ---- ff_linear: RobertaOutput dense + residual + LayerNorm ------------
    # hid_ref / wd_ref are already bf16 (cast in the wrapper / prepare_params).
    y = jnp.dot(hid_ref[...], wd_ref[...],
                preferred_element_type=jnp.float32)              # (TM, H)
    y = y + bd_ref[...].astype(jnp.float32) + inp

    # One-pass statistics: var = E[y^2] - E[y]^2 (single reduce pass over y).
    mean = jnp.mean(y, axis=-1, keepdims=True)
    mean_sq = jnp.mean(y * y, axis=-1, keepdims=True)
    var = jnp.maximum(mean_sq - mean * mean, 0.0)
    x = (y - mean) * lax.rsqrt(var + LN_EPS)
    x = x * gamma_ref[...] + beta_ref[...]                       # (TM, H), f32

    # ---- adapter bottleneck (R zero-padded to a multiple of 128 lanes) ----
    z = jnp.dot(x.astype(jnp.bfloat16), w0_ref[...],
                preferred_element_type=jnp.float32)              # (TM, Rp)
    z = z + b0_ref[...]
    z = 0.5 * z * (1.0 + lax.erf(z * _INV_SQRT2))                # exact GELU
    z = jnp.dot(z.astype(jnp.bfloat16), w1_ref[...],
                preferred_element_type=jnp.float32)              # (TM, H)
    z = z + b1_ref[...]

    out_ref[...] = (z + x).astype(out_ref.dtype)                 # adapter residual


# --------------------------------------------------------------------------
# Helpers
# --------------------------------------------------------------------------
def _round_up(x, m):
    return (x + m - 1) // m * m


def _nbytes(shape, dtype):
    n = 1
    for s in shape:
        n *= s
    return n * jnp.dtype(dtype).itemsize


def _tpu_vmem_capacity_bytes():
    """Physical VMEM of the local chip; conservative 64 MiB if unknown."""
    try:
        return int(pltpu.get_tpu_info().vmem_capacity_bytes)
    except Exception:
        return 64 << 20


def _resident_spec_factory():
    """BlockSpec factory for grid-invariant (weight) inputs.

    Single-buffers them (pipeline_mode=pl.Buffered(1)) when supported, since
    their index_map is constant and a second pipeline buffer is pure VMEM
    waste.  Returns (factory, single_buffered?)."""
    if hasattr(pl, "Buffered"):
        try:
            # Probe the constructor signature once.
            pl.BlockSpec((8, 128), lambda i: (0, 0), pipeline_mode=pl.Buffered(1))

            def make(shape):
                return pl.BlockSpec(shape, lambda i: (0, 0),
                                    pipeline_mode=pl.Buffered(1))
            return make, True
        except TypeError:
            pass
    return (lambda shape: pl.BlockSpec(shape, lambda i: (0, 0))), False


def prepare_params(params, lane=128):
    """Pad the bottleneck dim R up to a lane-dense multiple of 128 (results
    are bit-identical: GELU(0 + 0) = 0 hits zero rows of the padded w1) and
    cast the three matmul weights to bf16 for the MXU."""
    h, r = params["w0"].shape
    rp = _round_up(max(r, 1), lane)
    w0 = jnp.zeros((h, rp), jnp.float32).at[:, :r].set(params["w0"])
    b0 = jnp.zeros((1, rp), jnp.float32).at[:, :r].set(params["b0"])
    w1 = jnp.zeros((rp, h), jnp.float32).at[:r, :].set(params["w1"])
    return {
        "wd": params["wd"].astype(jnp.bfloat16),
        "bd": params["bd"].astype(jnp.float32),
        "gamma": params["gamma"].astype(jnp.float32),
        "beta": params["beta"].astype(jnp.float32),
        "w0": w0.astype(jnp.bfloat16),
        "b0": b0,
        "w1": w1.astype(jnp.bfloat16),
        "b1": params["b1"].astype(jnp.float32),
    }


# --------------------------------------------------------------------------
# Wrapper
# --------------------------------------------------------------------------
def roberta_adapter(hidden_states, input_tensor, kparams, *,
                    max_rows=None, out_dtype=None, min_grid_steps=4):
    """hidden_states: (B, S, I) FFN intermediate activations
       input_tensor : (B, S, H) residual stream into the output block
       kparams      : output of prepare_params()
       out_dtype    : output dtype (default: input_tensor.dtype; pass
                      jnp.bfloat16 to halve writeback on v5e if the consumer
                      accepts it)
       returns      : (B, S, H)"""
    B, S, I = hidden_states.shape
    H = input_tensor.shape[-1]
    M = B * S
    out_dtype = input_tensor.dtype if out_dtype is None else out_dtype

    # Generation-aware row tile: 64 MiB VMEM parts (v7x) get tm<=256,
    # 128 MiB parts (v5e/v6e) get tm<=512.  Sweepable via max_rows.
    vmem_cap = _tpu_vmem_capacity_bytes()
    if max_rows is None:
        max_rows = 256 if vmem_cap <= (64 << 20) else 512

    # Cap tm so the grid has >= min_grid_steps steps (megacore sharding on
    # v7x + DMA/compute overlap); keep it a bf16-safe multiple of 16.
    tm = min(_round_up(max_rows, 16),
             _round_up(pl.cdiv(M, min_grid_steps), 16))
    tm = max(tm, 16)
    m_pad = _round_up(M, tm)
    grid = (m_pad // tm,)

    # Dominant activation stream goes to HBM in bf16 (bit-identical to the
    # previous in-kernel cast: it only feeds the MXU).  Residual stream keeps
    # its dtype (it participates in f32 adds / LayerNorm).
    hid2 = hidden_states.reshape(M, I).astype(jnp.bfloat16)
    inp2 = input_tensor.reshape(M, H)
    if m_pad != M:
        hid2 = jnp.pad(hid2, ((0, m_pad - M), (0, 0)))
        inp2 = jnp.pad(inp2, ((0, m_pad - M), (0, 0)))

    row = lambda d: pl.BlockSpec((tm, d), lambda i: (i, 0))
    resident, single_buffered = _resident_spec_factory()

    rp = kparams["w0"].shape[1]

    # VMEM budget: double-buffered activation tiles + resident params
    # (1x if single-buffered, else 2x) + f32 body intermediates + slack,
    # capped at 75% of physical VMEM.
    act_bytes = 2 * (_nbytes((tm, I), hid2.dtype)
                     + _nbytes((tm, H), inp2.dtype)
                     + _nbytes((tm, H), out_dtype))
    w_mult = 1 if single_buffered else 2
    w_bytes = w_mult * sum(_nbytes(v.shape, v.dtype) for v in kparams.values())
    tmp_bytes = 4 * tm * H * 4 + 2 * tm * rp * 4
    vmem_limit = int(min(max(act_bytes + w_bytes + tmp_bytes + (2 << 20),
                             16 << 20),
                         int(0.75 * vmem_cap)))

    # Only request aliasing when it can actually hold (no row padding and
    # matching dtype).  Production callers should donate input_tensor at the
    # jit boundary to avoid a defensive copy.
    io_aliases = {1: 0} if (m_pad == M and inp2.dtype == jnp.dtype(out_dtype)) else {}

    out2 = pl.pallas_call(
        _roberta_adapter_kernel,
        out_shape=jax.ShapeDtypeStruct((m_pad, H), out_dtype),
        grid=grid,
        in_specs=[
            row(I),                                  # hidden_states tile (bf16)
            row(H),                                  # input_tensor tile
            resident(kparams["wd"].shape),
            resident(kparams["bd"].shape),
            resident(kparams["gamma"].shape),
            resident(kparams["beta"].shape),
            resident(kparams["w0"].shape),
            resident(kparams["b0"].shape),
            resident(kparams["w1"].shape),
            resident(kparams["b1"].shape),
        ],
        out_specs=row(H),
        input_output_aliases=io_aliases,
        compiler_params=pltpu.CompilerParams(
            dimension_semantics=("parallel",),       # megacore rows on v7x
            vmem_limit_bytes=vmem_limit,
        ),
    )(hid2, inp2,
      kparams["wd"], kparams["bd"], kparams["gamma"], kparams["beta"],
      kparams["w0"], kparams["b0"], kparams["w1"], kparams["b1"])

    return out2[:M].reshape(B, S, H)


# --------------------------------------------------------------------------
# Parameters + pure-JAX reference (f32, matches the PyTorch module)
# --------------------------------------------------------------------------
def init_params(key, h, r, intermediate):
    """Deterministic synthetic parameters, stored as (in_features, out_features)."""
    ks = jax.random.split(key, 6)
    scale = 0.02
    return {
        # ff_linear (RobertaOutput) dense: intermediate -> h
        "wd": scale * jax.random.normal(ks[0], (intermediate, h), jnp.float32),
        "bd": scale * jax.random.normal(ks[1], (1, h), jnp.float32),
        # LayerNorm affine
        "gamma": jnp.ones((1, h), jnp.float32),
        "beta": jnp.zeros((1, h), jnp.float32),
        # adapter down-projection lin0: h -> r
        "w0": scale * jax.random.normal(ks[2], (h, r), jnp.float32),
        "b0": scale * jax.random.normal(ks[3], (1, r), jnp.float32),
        # adapter up-projection lin1: r -> h
        "w1": scale * jax.random.normal(ks[4], (r, h), jnp.float32),
        "b1": scale * jax.random.normal(ks[5], (1, h), jnp.float32),
    }


def reference_forward(hidden_states, input_tensor, params):
    y = hidden_states @ params["wd"] + params["bd"][0]
    y = y + input_tensor
    mean = jnp.mean(y, axis=-1, keepdims=True)
    var = jnp.mean((y - mean) ** 2, axis=-1, keepdims=True)
    x = (y - mean) * lax.rsqrt(var + LN_EPS) * params["gamma"][0] + params["beta"][0]
    z = x @ params["w0"] + params["b0"][0]
    z = 0.5 * z * (1.0 + lax.erf(z * _INV_SQRT2))
    z = z @ params["w1"] + params["b1"][0]
    return z + x


# --------------------------------------------------------------------------
# Demo / correctness check
# --------------------------------------------------------------------------
if __name__ == "__main__":
    # Small shapes consistent with the module: batch=2, seq=8, hidden=32,
    # intermediate=4*hidden=128, adapter bottleneck r=8.
    # (Not lane-dense; fine for correctness, do not benchmark these shapes.)
    B, S, H, I, R = 2, 8, 32, 128, 8

    key = jax.random.PRNGKey(0)
    k_hid, k_inp, k_par = jax.random.split(key, 3)
    hidden_states = jax.random.normal(k_hid, (B, S, I), jnp.float32)
    input_tensor = jax.random.normal(k_inp, (B, S, H), jnp.float32)

    params = init_params(k_par, H, R, I)
    kparams = prepare_params(params)

    ref = reference_forward(hidden_states, input_tensor, params)
    in_dtype = input_tensor.dtype

    fwd = jax.jit(roberta_adapter)
    out = jax.block_until_ready(fwd(hidden_states, input_tensor, kparams))

    assert out.shape == (B, S, H)
    assert out.dtype == in_dtype
    max_err = float(jnp.max(jnp.abs(out.astype(jnp.float32) - ref)))
    # bf16 MXU weights/activations with f32 accumulation -> loosened tolerance
    # vs the f32 reference.
    assert jnp.allclose(out.astype(jnp.float32), ref, atol=3e-2, rtol=3e-2), (
        f"mismatch vs reference, max_abs_err={max_err}")

    print("KERNEL_OK")
</pallas_src>

<mosaic_0001>
module attributes {stable_mosaic.version = 11 : i64} {
  func.func @_roberta_adapter_kernel(%arg0: i32, %arg1: memref<16x128xbf16, #tpu.memory_space<vmem>>, %arg2: memref<16x32xf32, #tpu.memory_space<vmem>>, %arg3: memref<128x32xbf16, #tpu.memory_space<vmem>>, %arg4: memref<1x32xf32, #tpu.memory_space<vmem>>, %arg5: memref<1x32xf32, #tpu.memory_space<vmem>>, %arg6: memref<1x32xf32, #tpu.memory_space<vmem>>, %arg7: memref<32x128xbf16, #tpu.memory_space<vmem>>, %arg8: memref<1x128xf32, #tpu.memory_space<vmem>>, %arg9: memref<128x32xbf16, #tpu.memory_space<vmem>>, %arg10: memref<1x32xf32, #tpu.memory_space<vmem>>, %arg11: memref<16x32xf32, #tpu.memory_space<vmem>>) attributes {dimension_semantics = [#tpu.dimension_semantics<parallel>], iteration_bounds = array<i64: 1>, scalar_prefetch = 0 : i64, scratch_operands = 0 : i64, tpu.core_type = #tpu.core_type<tc>, window_params = [{transform_indices = @transform_0, window_bounds = array<i64: 16, 128>}, {transform_indices = @transform_1, window_bounds = array<i64: 16, 32>}, {pipeline_mode = #tpu.pipeline_mode<synchronous>, transform_indices = @transform_2, window_bounds = array<i64: 128, 32>}, {pipeline_mode = #tpu.pipeline_mode<synchronous>, transform_indices = @transform_3, window_bounds = array<i64: 1, 32>}, {pipeline_mode = #tpu.pipeline_mode<synchronous>, transform_indices = @transform_4, window_bounds = array<i64: 1, 32>}, {pipeline_mode = #tpu.pipeline_mode<synchronous>, transform_indices = @transform_5, window_bounds = array<i64: 1, 32>}, {pipeline_mode = #tpu.pipeline_mode<synchronous>, transform_indices = @transform_6, window_bounds = array<i64: 32, 128>}, {pipeline_mode = #tpu.pipeline_mode<synchronous>, transform_indices = @transform_7, window_bounds = array<i64: 1, 128>}, {pipeline_mode = #tpu.pipeline_mode<synchronous>, transform_indices = @transform_8, window_bounds = array<i64: 128, 32>}, {pipeline_mode = #tpu.pipeline_mode<synchronous>, transform_indices = @transform_9, window_bounds = array<i64: 1, 32>}, {transform_indices = @transform_10, window_bounds = array<i64: 16, 32>}]} {
    %c0 = arith.constant 0 : index
    %c0_0 = arith.constant 0 : index
    %0 = vector.load %arg2[%c0, %c0_0] : memref<16x32xf32, #tpu.memory_space<vmem>>, vector<16x32xf32>
    %c0_1 = arith.constant 0 : index
    %c0_2 = arith.constant 0 : index
    %1 = vector.load %arg1[%c0_1, %c0_2] : memref<16x128xbf16, #tpu.memory_space<vmem>>, vector<16x128xbf16>
    %c0_3 = arith.constant 0 : index
    %c0_4 = arith.constant 0 : index
    %2 = vector.load %arg3[%c0_3, %c0_4] : memref<128x32xbf16, #tpu.memory_space<vmem>>, vector<128x32xbf16>
    %cst = arith.constant dense<0.000000e+00> : vector<16x32xf32>
    %3 = tpu.matmul %1, %2, %cst {dimension_numbers = #tpu.dot_dimension_numbers<[1], [0], [0], [1], [0, 0, 1, 1], [], []>} : vector<16x128xbf16>, vector<128x32xbf16>, vector<16x32xf32> -> vector<16x32xf32>
    %c0_5 = arith.constant 0 : index
    %c0_6 = arith.constant 0 : index
    %4 = vector.load %arg4[%c0_5, %c0_6] : memref<1x32xf32, #tpu.memory_space<vmem>>, vector<1x32xf32>
    %5 = vector.broadcast %4 : vector<1x32xf32> to vector<16x32xf32>
    %6 = arith.addf %3, %5 : vector<16x32xf32>
    %7 = arith.addf %6, %0 : vector<16x32xf32>
    %cst_7 = arith.constant dense<0.000000e+00> : vector<16xf32>
    %8 = vector.multi_reduction <add>, %7, %cst_7 [1] : vector<16x32xf32> to vector<16xf32>
    %9 = vector.shape_cast %8 : vector<16xf32> to vector<16x1xf32>
    %cst_8 = arith.constant 3.200000e+01 : f32
    %10 = vector.broadcast %cst_8 : f32 to vector<16x1xf32>
    %11 = arith.divf %9, %10 : vector<16x1xf32>
    %12 = arith.mulf %7, %7 : vector<16x32xf32>
    %cst_9 = arith.constant dense<0.000000e+00> : vector<16xf32>
    %13 = vector.multi_reduction <add>, %12, %cst_9 [1] : vector<16x32xf32> to vector<16xf32>
    %14 = vector.shape_cast %13 : vector<16xf32> to vector<16x1xf32>
    %cst_10 = arith.constant 3.200000e+01 : f32
    %15 = vector.broadcast %cst_10 : f32 to vector<16x1xf32>
    %16 = arith.divf %14, %15 : vector<16x1xf32>
    %17 = arith.mulf %11, %11 : vector<16x1xf32>
    %18 = arith.subf %16, %17 : vector<16x1xf32>
    %cst_11 = arith.constant 0.000000e+00 : f32
    %19 = vector.broadcast %cst_11 : f32 to vector<16x1xf32>
    %20 = arith.maximumf %18, %19 : vector<16x1xf32>
    %21 = vector.broadcast %11 : vector<16x1xf32> to vector<16x32xf32>
    %22 = arith.subf %7, %21 : vector<16x32xf32>
    %cst_12 = arith.constant 9.99999974E-6 : f32
    %23 = vector.broadcast %cst_12 : f32 to vector<16x1xf32>
    %24 = arith.addf %20, %23 : vector<16x1xf32>
    %25 = math.rsqrt %24 : vector<16x1xf32>
    %26 = vector.broadcast %25 : vector<16x1xf32> to vector<16x32xf32>
    %27 = arith.mulf %22, %26 : vector<16x32xf32>
    %c0_13 = arith.constant 0 : index
    %c0_14 = arith.constant 0 : index
    %28 = vector.load %arg5[%c0_13, %c0_14] : memref<1x32xf32, #tpu.memory_space<vmem>>, vector<1x32xf32>
    %29 = vector.broadcast %28 : vector<1x32xf32> to vector<16x32xf32>
    %30 = arith.mulf %27, %29 : vector<16x32xf32>
    %c0_15 = arith.constant 0 : index
    %c0_16 = arith.constant 0 : index
    %31 = vector.load %arg6[%c0_15, %c0_16] : memref<1x32xf32, #tpu.memory_space<vmem>>, vector<1x32xf32>
    %32 = vector.broadcast %31 : vector<1x32xf32> to vector<16x32xf32>
    %33 = arith.addf %30, %32 : vector<16x32xf32>
    %34 = arith.truncf %33 : vector<16x32xf32> to vector<16x32xbf16>
    %c0_17 = arith.constant 0 : index
    %c0_18 = arith.constant 0 : index
    %35 = vector.load %arg7[%c0_17, %c0_18] : memref<32x128xbf16, #tpu.memory_space<vmem>>, vector<32x128xbf16>
    %cst_19 = arith.constant dense<0.000000e+00> : vector<16x128xf32>
    %36 = tpu.matmul %34, %35, %cst_19 {dimension_numbers = #tpu.dot_dimension_numbers<[1], [0], [0], [1], [0, 0, 1, 1], [], []>} : vector<16x32xbf16>, vector<32x128xbf16>, vector<16x128xf32> -> vector<16x128xf32>
    %c0_20 = arith.constant 0 : index
    %c0_21 = arith.constant 0 : index
    %37 = vector.load %arg8[%c0_20, %c0_21] : memref<1x128xf32, #tpu.memory_space<vmem>>, vector<1x128xf32>
    %38 = vector.broadcast %37 : vector<1x128xf32> to vector<16x128xf32>
    %39 = arith.addf %36, %38 : vector<16x128xf32>
    %cst_22 = arith.constant 5.000000e-01 : f32
    %40 = vector.broadcast %cst_22 : f32 to vector<16x128xf32>
    %41 = arith.mulf %40, %39 : vector<16x128xf32>
    %cst_23 = arith.constant 0.707106769 : f32
    %42 = vector.broadcast %cst_23 : f32 to vector<16x128xf32>
    %43 = arith.mulf %39, %42 : vector<16x128xf32>
    %44 = math.erf %43 : vector<16x128xf32>
    %cst_24 = arith.constant 1.000000e+00 : f32
    %45 = vector.broadcast %cst_24 : f32 to vector<16x128xf32>
    %46 = arith.addf %45, %44 : vector<16x128xf32>
    %47 = arith.mulf %41, %46 : vector<16x128xf32>
    %48 = arith.truncf %47 : vector<16x128xf32> to vector<16x128xbf16>
    %c0_25 = arith.constant 0 : index
    %c0_26 = arith.constant 0 : index
    %49 = vector.load %arg9[%c0_25, %c0_26] : memref<128x32xbf16, #tpu.memory_space<vmem>>, vector<128x32xbf16>
    %cst_27 = arith.constant dense<0.000000e+00> : vector<16x32xf32>
    %50 = tpu.matmul %48, %49, %cst_27 {dimension_numbers = #tpu.dot_dimension_numbers<[1], [0], [0], [1], [0, 0, 1, 1], [], []>} : vector<16x128xbf16>, vector<128x32xbf16>, vector<16x32xf32> -> vector<16x32xf32>
    %c0_28 = arith.constant 0 : index
    %c0_29 = arith.constant 0 : index
    %51 = vector.load %arg10[%c0_28, %c0_29] : memref<1x32xf32, #tpu.memory_space<vmem>>, vector<1x32xf32>
    %52 = vector.broadcast %51 : vector<1x32xf32> to vector<16x32xf32>
    %53 = arith.addf %50, %52 : vector<16x32xf32>
    %54 = arith.addf %53, %33 : vector<16x32xf32>
    %c0_30 = arith.constant 0 : index
    %c0_31 = arith.constant 0 : index
    %55 = vector.load %arg11[%c0_30, %c0_31] : memref<16x32xf32, #tpu.memory_space<vmem>>, vector<16x32xf32>
    tpu.vector_store %arg11[%c0_30, %c0_31], %54 {strides = array<i32>} : memref<16x32xf32, #tpu.memory_space<vmem>>, vector<16x32xf32>,
    return
  }
  func.func @transform_0(%arg0: i32) -> (i32, i32) {
    %c0_i32 = arith.constant 0 : i32
    %c0_i32_0 = arith.constant 0 : i32
    return %arg0, %c0_i32 : i32, i32
  }
  func.func @transform_1(%arg0: i32) -> (i32, i32) {
    %c0_i32 = arith.constant 0 : i32
    %c0_i32_0 = arith.constant 0 : i32
    return %arg0, %c0_i32 : i32, i32
  }
  func.func @transform_2(%arg0: i32) -> (i32, i32) {
    %c0_i32 = arith.constant 0 : i32
    %c0_i32_0 = arith.constant 0 : i32
    %c0_i32_1 = arith.constant 0 : i32
    return %c0_i32, %c0_i32_0 : i32, i32
  }
  func.func @transform_3(%arg0: i32) -> (i32, i32) {
    %c0_i32 = arith.constant 0 : i32
    %c0_i32_0 = arith.constant 0 : i32
    %c0_i32_1 = arith.constant 0 : i32
    return %c0_i32, %c0_i32_0 : i32, i32
  }
  func.func @transform_4(%arg0: i32) -> (i32, i32) {
    %c0_i32 = arith.constant 0 : i32
    %c0_i32_0 = arith.constant 0 : i32
    %c0_i32_1 = arith.constant 0 : i32
    return %c0_i32, %c0_i32_0 : i32, i32
  }
  func.func @transform_5(%arg0: i32) -> (i32, i32) {
    %c0_i32 = arith.constant 0 : i32
    %c0_i32_0 = arith.constant 0 : i32
    %c0_i32_1 = arith.constant 0 : i32
    return %c0_i32, %c0_i32_0 : i32, i32
  }
  func.func @transform_6(%arg0: i32) -> (i32, i32) {
    %c0_i32 = arith.constant 0 : i32
    %c0_i32_0 = arith.constant 0 : i32
    %c0_i32_1 = arith.constant 0 : i32
    return %c0_i32, %c0_i32_0 : i32, i32
  }
  func.func @transform_7(%arg0: i32) -> (i32, i32) {
    %c0_i32 = arith.constant 0 : i32
    %c0_i32_0 = arith.constant 0 : i32
    %c0_i32_1 = arith.constant 0 : i32
    return %c0_i32, %c0_i32_0 : i32, i32
  }
  func.func @transform_8(%arg0: i32) -> (i32, i32) {
    %c0_i32 = arith.constant 0 : i32
    %c0_i32_0 = arith.constant 0 : i32
    %c0_i32_1 = arith.constant 0 : i32
    return %c0_i32, %c0_i32_0 : i32, i32
  }
  func.func @transform_9(%arg0: i32) -> (i32, i32) {
    %c0_i32 = arith.constant 0 : i32
    %c0_i32_0 = arith.constant 0 : i32
    %c0_i32_1 = arith.constant 0 : i32
    return %c0_i32, %c0_i32_0 : i32, i32
  }
  func.func @transform_10(%arg0: i32) -> (i32, i32) {
    %c0_i32 = arith.constant 0 : i32
    %c0_i32_0 = arith.constant 0 : i32
    return %arg0, %c0_i32 : i32, i32
  }
}

</mosaic_0001>

<bundles_post_ra>
// kernel: roberta_adapter.1
= control target key start
LH: loop header
LB: loop body
LE: loop exit
PB: predicated region body
PF: predicated region fallthrough
CT: control target
= control target key end

     0   :  { %v534_v0 = vmov 0.0   ;;  %vm535_vm0 = vmmov 0   ;;  %vm160_vm1 = vcmask 261120   ;;  %s706_s2 = inlined_call_operand.vmem [shape: bf16[128,32], index: 2, kind: input, shape index: {}]   ;;  %s707_s0 = inlined_call_operand.vmem [shape: bf16[16,128], index: 0, kind: input, shape index: {}]   ;;  %s708_s3 = inlined_call_operand.vmem [shape: f32[1,32], index: 3, kind: input, shape index: {}]   ;;  %s709_s1 = inlined_call_operand.vmem [shape: f32[16,32], index: 1, kind: input, shape index: {}, may-alias: {1,10}]   ;;  %s710_s6 = inlined_call_operand.vmem [shape: bf16[32,128], index: 6, kind: input, shape index: {}]   ;;  %s711_s8 = inlined_call_operand.vmem [shape: bf16[128,32], index: 8, kind: input, shape index: {}]   ;;  %s712_s4 = inlined_call_operand.vmem [shape: f32[1,32], index: 4, kind: input, shape index: {}]   ;;  %s713_s5 = inlined_call_operand.vmem [shape: f32[1,32], index: 5, kind: input, shape index: {}]   ;;  %s714_s7 = inlined_call_operand.vmem [shape: f32[1,128], index: 7, kind: input, shape index: {}]   ;;  %s715_s9 = inlined_call_operand.vmem [shape: f32[1,32], index: 9, kind: input, shape index: {}]   ;;  %s716_s10 = inlined_call_operand.vmem [shape: f32[16,32], index: 10, kind: output, shape index: {}, may-alias: {1,10}]  }
   0x1   :  { %457 = vmatprep.subr.bf16.mxu0 %v534_v0  ;;  %v507_v1 = vld [vmem:[%s706_s2] sm:$0xff]   ;;  %473 = vmatprep.mubr.msk.bf16.mxu0 %vm535_vm0, %v534_v0  ;;  %v508_v2 = vld [vmem:[%s706_s2 + $0x8] sm:$0xff]   ;;  %v509_v3 = vld [vmem:[%s706_s2 + $0x10] sm:$0xff]  }
   0x2   :  { %477 = vmatprep.subr.bf16.mxu1 %v534_v0  ;;  %481 = vmatprep.mubr.msk.bf16.mxu1 %vm535_vm0, %v534_v0  ;;  %v510_v4 = vld [vmem:[%s706_s2 + $0x18] sm:$0xff]   ;;  %v511_v5 = vld [vmem:[%s706_s2 + $0x20] sm:$0xff]   ;;  %v512_v6 = vld [vmem:[%s706_s2 + $0x28] sm:$0xff]  }
   0x3   :  { %458 = vmatpush3.bf16.msra.mxu0 %v507_v1  ;;  %v513_v7 = vld [vmem:[%s706_s2 + $0x30] sm:$0xff]   ;;  %v514_v8 = vld [vmem:[%s706_s2 + $0x38] sm:$0xff]   ;;  %v515_v9 = vld [vmem:[%s707_s0] sm:$0xff]  }
   0x4   :  { %459 = vmatprep.subr.bf16.mxu0 %v534_v0  ;;  %v411_v10 = vld [vmem:[%s708_s3] ss:$0 sm:$0xff]  ;;  %v37_v15 = vld [vmem:[%s709_s1 + $0x8] sm:$0xff]  ;;  %v520_v60 = vld [vmem:[%s711_s8 + $0x10] sm:$0xff]  }
   0x5   :  { %v36_v11 = vld [vmem:[%s709_s1] sm:$0xff]  ;;  %v517_v28 = vld [vmem:[%s710_s6 + $0x8] sm:$0xff]   ;;  %v521_v61 = vld [vmem:[%s711_s8 + $0x18] sm:$0xff]  }
   0x6   :  { %v516_v27 = vld [vmem:[%s710_s6] sm:$0xff]   ;;  %v519_v59 = vld [vmem:[%s711_s8 + $0x8] sm:$0xff]   ;;  %v524_v1 = vld [vmem:[%s711_s8 + $0x30] sm:$0xff]  }
   0x7   :  { %460 = vmatpush3.bf16.msra.mxu0 %v508_v2  ;;  %478 = vmatpush3.bf16.msra.mxu1 %v516_v27  ;;  %v421_v48 = vld [vmem:[%s712_s4] ss:$0 sm:$0xff]  ;;  %v523_v63 = vld [vmem:[%s711_s8 + $0x28] sm:$0xff]   ;;  %v525_v2 = vld [vmem:[%s711_s8 + $0x38] sm:$0xff]  }
   0x8   :  { %461 = vmatprep.subr.bf16.mxu0 %v534_v0  ;;  %479 = vmatprep.subr.bf16.mxu1 %v534_v0  ;;  %v422_v53 = vld [vmem:[%s713_s5] ss:$0 sm:$0xff] }
   0x9   :  { %v518_v57 = vld [vmem:[%s711_s8] sm:$0xff]  }
   0xa   :  { %v522_v62 = vld [vmem:[%s711_s8 + $0x20] sm:$0xff]  }
   0xb   :  { %462 = vmatpush3.bf16.msra.mxu0 %v509_v3  ;;  %480 = vmatpush3.bf16.msra.mxu1 %v517_v28  ;;  %v423_v3 = vld [vmem:[%s714_s7] ss:$0 sm:$0xff] }
   0xc   :  { %463 = vmatprep.subr.bf16.mxu0 %v534_v0  ;;  %485 = vmatprep.subr.bf16.mxu1 %v534_v0 }
   0xf   :  { %464 = vmatpush3.bf16.msra.mxu0 %v510_v4 }
  0x10   :  { %465 = vmatprep.subr.bf16.mxu0 %v534_v0 }
  0x13   :  { %466 = vmatpush3.bf16.msra.mxu0 %v511_v5 }
  0x14   :  { %467 = vmatprep.subr.bf16.mxu0 %v534_v0 }
  0x17   :  { %468 = vmatpush3.bf16.msra.mxu0 %v512_v6 }
  0x18   :  { %469 = vmatprep.subr.bf16.mxu0 %v534_v0 }
  0x1b   :  { %470 = vmatpush3.bf16.msra.mxu0 %v513_v7 }
  0x1c   :  { %471 = vmatprep.subr.bf16.mxu0 %v534_v0 }
  0x1f   :  { %472 = vmatpush3.bf16.msra.mxu0 %v514_v8 }
  0x22   :  { %474 = vmatmul.mubr.bf16.vlgmr.msra.gmra.mrb[0].mxu0 %v515_v9 }
  0xf5   :  { %v151_v12 = vpop.f32.mrb[0].mxu0 }
  0xf6   :  { %v152_v13 = vadd.f32 %v411_v10, %v151_v12  ;;  %v475_v14 = vpop.f32.mrb[1].mxu0 }
  0xf7   :  { %v154_v16 = vpop.f32.mrb[2].mxu0 }
  0xf8   :  { %v158_v17 = vadd.f32 %v152_v13, %v36_v11  ;;  %v155_v18 = vadd.f32 %v411_v10, %v154_v16  ;;  %v476_v19 = vpop.f32.mrb[3].mxu0 }
  0xfa   :  { %v159_v20 = vadd.f32 %v155_v18, %v37_v15  ;;  %v161_v21 = vsel %vm160_vm1, %v158_v17, 0.0  ;;  %v170_v22 = vmul.f32 %v158_v17, %v158_v17 }
  0xfb   :  { %162 = vadd.xlane.f32.xlu0 %v161_v21 }
  0xfc   :  { %v172_v23 = vsel %vm160_vm1, %v170_v22, 0.0  ;;  %v171_v24 = vmul.f32 %v159_v20, %v159_v20  ;;  %v164_v25 = vsel %vm160_vm1, %v159_v20, 0.0 }
  0xfd   :  { %173 = vadd.xlane.f32.xlu1 %v172_v23 }
  0xfe   :  { %v175_v26 = vsel %vm160_vm1, %v171_v24, 0.0 }
  0xff   :  { %165 = vadd.xlane.f32.xlu0 %v164_v25 }
 0x101   :  { %176 = vadd.xlane.f32.xlu1 %v175_v26 }
 0x188   :  { %v163_v29 = vpop.xlane.xlu0 %162 }
 0x189   :  { %v168_v30 = vmul.f32 0.03125, %v163_v29 }
 0x18a   :  { %v174_v31 = vpop.xlane.xlu1 %173 }
 0x18b   :  { %v180_v32 = vmul.f32 %v168_v30, %v168_v30  ;;  %v178_v33 = vmul.f32 0.03125, %v174_v31  ;;  %v186_v45 = vsub.f32 %v158_v17, %v168_v30 }
 0x18c   :  { %v166_v34 = vpop.xlane.xlu0 %165 }
 0x18d   :  { %v182_v35 = vsub.f32 %v178_v33, %v180_v32  ;;  %v169_v36 = vmul.f32 0.03125, %v166_v34 }
 0x18e   :  { %v177_v37 = vpop.xlane.xlu1 %176 }
 0x18f   :  { %v184_v38 = vmax.f32 %v182_v35, 0.0  ;;  %v181_v39 = vmul.f32 %v169_v36, %v169_v36  ;;  %v179_v40 = vmul.f32 0.03125, %v177_v37  ;;  %v187_v49 = vsub.f32 %v159_v20, %v169_v36  ;;  %v427_v20 = vld [vmem:[%s715_s9] ss:$0 sm:$0xff] }
 0x191   :  { %v188_v41 = vadd.f32 1e-05, %v184_v38  ;;  %v183_v42 = vsub.f32 %v179_v40, %v181_v39 }
 0x193   :  { %526 = vrsqrt.f32 %v188_v41  ;;  %v185_v43 = vmax.f32 %v183_v42, 0.0 }
 0x195   :  { %v189_v44 = vadd.f32 1e-05, %v185_v43 }
 0x197   :  { %528 = vrsqrt.f32 %v189_v44 }
 0x19d   :  { %v527_v46 = vpop.eup %526 }
 0x19e   :  { %v192_v47 = vmul.f32 %v527_v46, %v186_v45 }
 0x1a0   :  { %v201_v52 = vmul.f32 %v421_v48, %v192_v47 }
 0x1a1   :  { %v529_v50 = vpop.eup %528 }
 0x1a2   :  { %v193_v51 = vmul.f32 %v529_v50, %v187_v49  ;;  %v210_v55 = vadd.f32 %v422_v53, %v201_v52 }
 0x1a4   :  { %v202_v54 = vmul.f32 %v421_v48, %v193_v51 }
 0x1a6   :  { %v211_v56 = vadd.f32 %v422_v53, %v202_v54 }
 0x1a8   :  { %v212_v58 = vpack.c.bf16 %v211_v56, %v210_v55 }
 0x1aa   :  { %482 = vmatmul.mubr.msk.bf16.vlgmr.msra.gmra.mrb[0].mxu1 %vm160_vm1, %v212_v58 }
 0x1ab   :  { %486 = vmatpush3.bf16.msra.mxu1 %v518_v57  ;;  %501 = vmatprep.mubr.msk.bf16.mxu1 %vm535_vm0, %v534_v0 }
 0x1ac   :  { %487 = vmatprep.subr.bf16.mxu1 %v534_v0 }
 0x1af   :  { %488 = vmatpush3.bf16.msra.mxu1 %v519_v59 }
 0x1b0   :  { %489 = vmatprep.subr.bf16.mxu1 %v534_v0 }
 0x1b3   :  { %490 = vmatpush3.bf16.msra.mxu1 %v520_v60 }
 0x1b4   :  { %491 = vmatprep.subr.bf16.mxu1 %v534_v0 }
 0x1b7   :  { %492 = vmatpush3.bf16.msra.mxu1 %v521_v61 }
 0x1b8   :  { %493 = vmatprep.subr.bf16.mxu1 %v534_v0 }
 0x1bb   :  { %494 = vmatpush3.bf16.msra.mxu1 %v522_v62 }
 0x1bc   :  { %495 = vmatprep.subr.bf16.mxu1 %v534_v0 }
 0x1bf   :  { %496 = vmatpush3.bf16.msra.mxu1 %v523_v63 }
 0x1c0   :  { %497 = vmatprep.subr.bf16.mxu1 %v534_v0 }
 0x1c3   :  { %498 = vmatpush3.bf16.msra.mxu1 %v524_v1 }
 0x1c4   :  { %499 = vmatprep.subr.bf16.mxu1 %v534_v0 }
 0x1c7   :  { %500 = vmatpush3.bf16.msra.mxu1 %v525_v2 }
 0x27d   :  { %v273_v4 = vpop.f32.mrb[0].mxu1 }
 0x27e   :  { %v274_v5 = vadd.f32 %v423_v3, %v273_v4  ;;  %v483_v6 = vpop.f32.mrb[1].mxu1 }
 0x27f   :  { %v276_v7 = vpop.f32.mrb[2].mxu1 }
 0x280   :  { %v282_v8 = vmul.f32 0.70710677, %v274_v5  ;;  %v277_v9 = vadd.f32 %v423_v3, %v276_v7  ;;  %v484_v10 = vpop.f32.mrb[3].mxu1  ;;  %v280_v14 = vmul.f32 0.5, %v274_v5 }
 0x282   :  { %530 = verf.f32 %v282_v8  ;;  %v283_v11 = vmul.f32 0.70710677, %v277_v9  ;;  %v281_v15 = vmul.f32 0.5, %v277_v9 }
 0x284   :  { %532 = verf.f32 %v283_v11 }
 0x28c   :  { %v531_v0 = vpop.eup %530 }
 0x28d   :  { %v286_v12 = vadd.f32 1.0, %v531_v0 }
 0x28e   :  { %v533_v13 = vpop.eup %532 }
 0x28f   :  { %v287_v16 = vadd.f32 1.0, %v533_v13  ;;  %v288_v17 = vmul.f32 %v286_v12, %v280_v14 }
 0x291   :  { %v289_v18 = vmul.f32 %v287_v16, %v281_v15 }
 0x293   :  { %v290_v19 = vpack.c.bf16 %v289_v18, %v288_v17 }
 0x295   :  { %502 = vmatmul.mubr.bf16.vlgmr.msra.gmra.mrb[4].mxu1 %v290_v19 }
 0x368   :  { %v396_v21 = vpop.f32.mrb[4].mxu1 }
 0x369   :  { %v397_v22 = vadd.f32 %v427_v20, %v396_v21  ;;  %v503_v23 = vpop.f32.mrb[5].mxu1 }
 0x36a   :  { %v399_v24 = vpop.f32.mrb[6].mxu1 }
 0x36b   :  { %v403_v25 = vadd.f32 %v397_v22, %v210_v55  ;;  %v400_v26 = vadd.f32 %v427_v20, %v399_v24  ;;  %v504_v27 = vpop.f32.mrb[7].mxu1 }
 0x36d   :  { %405 = vst.msk [vmem:[%s716_s10] sm:$0xff] %vm160_vm1, %v403_v25  ;;  %v404_v28 = vadd.f32 %v400_v26, %v211_v56 }
 0x36f   :  { %406 = vst.msk [vmem:[%s716_s10 + $0x8] sm:$0xff] %vm160_vm1, %v404_v28 }

</bundles_post_ra>
